<compile_context>
chip_gen: v7x
topology: tpu7x:2x2x1
jax: 0.10.0
libtpu: 0.0.40
codegen_flags: <defaults>
</compile_context>

<pallas_src>
import math

import jax
import jax.numpy as jnp
from jax.experimental import pallas as pl
from jax.experimental.pallas import tpu as pltpu

_H1, _H2 = 400, 300          # logical hidden sizes (PyTorch module)
_H1P, _H2P = 512, 384        # lane-aligned padded hidden sizes (multiples of 128)


def _actor_kernel(s_ref, w1_ref, b1_ref, w2_ref, b2_ref, w3_ref, b3_ref, out_ref):
    # Layer 1: Linear(state_dim -> 512pad) + LeakyReLU   (bf16 MXU, f32 accum)
    x = s_ref[...].astype(jnp.bfloat16)
    h1 = jnp.dot(x, w1_ref[...], preferred_element_type=jnp.float32) + b1_ref[...]
    h1 = jnp.where(h1 >= 0.0, h1, 0.01 * h1)

    # Layer 2: Linear(512pad -> 384pad) + LeakyReLU
    h2 = jnp.dot(h1.astype(jnp.bfloat16), w2_ref[...],
                 preferred_element_type=jnp.float32) + b2_ref[...]
    h2 = jnp.where(h2 >= 0.0, h2, 0.01 * h2)

    # Layer 3: Linear(384pad -> 128pad) + Tanh
    a = jnp.dot(h2.astype(jnp.bfloat16), w3_ref[...],
                preferred_element_type=jnp.float32) + b3_ref[...]
    out_ref[...] = jnp.tanh(a).astype(out_ref.dtype)


def actor_forward(s, params, *, tb=256):
    """Fused Actor MLP.

    s: (batch, state_dim) float32
    params: dict produced by init_actor_params (padded, bf16 weights / f32 biases)
    returns: (batch, action_dim) float32 in [-1, 1]
    """
    batch, state_dim = s.shape
    action_dim = params["action_dim"]
    h1p = params["w1"].shape[1]      # 512
    h2p = params["w2"].shape[1]      # 384
    ap = params["w3"].shape[1]       # lane-padded action dim (>=128)

    # Batch tiling: for large batches use TB=tb and pipeline over the grid;
    # for tiny batches just pad to a multiple of 8 and run one grid step.
    if batch >= tb:
        TB = tb
        padded_batch = pl.cdiv(batch, TB) * TB
    else:
        padded_batch = max(8, ((batch + 7) // 8) * 8)
        TB = padded_batch
    if padded_batch != batch:
        s = jnp.pad(s, ((0, padded_batch - batch), (0, 0)))

    grid = (padded_batch // TB,)

    cost = pl.CostEstimate(
        flops=2 * padded_batch * (state_dim * h1p + h1p * h2p + h2p * ap),
        transcendentals=padded_batch * ap,
        bytes_accessed=(
            padded_batch * state_dim * 4          # states in (f32)
            + padded_batch * ap * 4               # actions out (f32)
            + (params["w1"].size + params["w2"].size + params["w3"].size) * 2
            + (params["b1"].size + params["b2"].size + params["b3"].size) * 4
        ),
    )

    out = pl.pallas_call(
        _actor_kernel,
        out_shape=jax.ShapeDtypeStruct((padded_batch, ap), jnp.float32),
        grid=grid,
        in_specs=[
            pl.BlockSpec((TB, state_dim), lambda i: (i, 0)),   # states: tiled on batch
            pl.BlockSpec((state_dim, h1p), lambda i: (0, 0)),  # weights/biases: resident
            pl.BlockSpec((1, h1p), lambda i: (0, 0)),
            pl.BlockSpec((h1p, h2p), lambda i: (0, 0)),
            pl.BlockSpec((1, h2p), lambda i: (0, 0)),
            pl.BlockSpec((h2p, ap), lambda i: (0, 0)),
            pl.BlockSpec((1, ap), lambda i: (0, 0)),
        ],
        out_specs=pl.BlockSpec((TB, ap), lambda i: (i, 0)),
        compiler_params=pltpu.CompilerParams(dimension_semantics=("parallel",)),
        cost_estimate=cost,
    )(s, params["w1"], params["b1"], params["w2"], params["b2"],
      params["w3"], params["b3"])

    # Slice lane/batch padding away in the wrapper (layout plumbing, no compute).
    return out[:batch, :action_dim]


# ---------------------------------------------------------------------------
# Parameter init — matches the PyTorch module:
#   layer_1/2 weights: kaiming_uniform_(nonlinearity='leaky_relu', a=0) -> gain sqrt(2)
#   layer_3 weight:    nn.Linear default (kaiming_uniform a=sqrt(5))   -> bound 1/sqrt(fan_in)
#   all biases:        nn.Linear default U(-1/sqrt(fan_in), 1/sqrt(fan_in))
# Weights stored as (in, out) for x @ W, zero-padded to lane-aligned shapes, bf16.
# ---------------------------------------------------------------------------
def _kaiming_uniform_leaky(key, fan_in, fan_out):
    gain = math.sqrt(2.0)                       # a = 0, leaky_relu
    bound = gain * math.sqrt(3.0 / fan_in)
    return jax.random.uniform(key, (fan_in, fan_out), jnp.float32, -bound, bound)


def _linear_default_weight(key, fan_in, fan_out):
    bound = 1.0 / math.sqrt(fan_in)             # kaiming_uniform a=sqrt(5) == 1/sqrt(fan_in)
    return jax.random.uniform(key, (fan_in, fan_out), jnp.float32, -bound, bound)


def _linear_default_bias(key, fan_in, fan_out):
    bound = 1.0 / math.sqrt(fan_in)
    return jax.random.uniform(key, (1, fan_out), jnp.float32, -bound, bound)


def init_actor_params(key, state_dim, action_dim):
    ap = max(128, ((action_dim + 127) // 128) * 128)   # lane-dense output width
    k = jax.random.split(key, 6)

    w1 = _kaiming_uniform_leaky(k[0], state_dim, _H1)
    b1 = _linear_default_bias(k[1], state_dim, _H1)
    w2 = _kaiming_uniform_leaky(k[2], _H1, _H2)
    b2 = _linear_default_bias(k[3], _H1, _H2)
    w3 = _linear_default_weight(k[4], _H2, action_dim)
    b3 = _linear_default_bias(k[5], _H2, action_dim)

    return {
        "w1": jnp.pad(w1, ((0, 0), (0, _H1P - _H1))).astype(jnp.bfloat16),
        "b1": jnp.pad(b1, ((0, 0), (0, _H1P - _H1))),
        "w2": jnp.pad(w2, ((0, _H1P - _H1), (0, _H2P - _H2))).astype(jnp.bfloat16),
        "b2": jnp.pad(b2, ((0, 0), (0, _H2P - _H2))),
        "w3": jnp.pad(w3, ((0, _H2P - _H2), (0, ap - action_dim))).astype(jnp.bfloat16),
        "b3": jnp.pad(b3, ((0, 0), (0, ap - action_dim))),
        "action_dim": action_dim,
    }


def _reference(s, params, action_dim):
    # Pure-JAX reference with the same (bf16-quantized, zero-padded) weights.
    w1 = params["w1"].astype(jnp.float32)
    w2 = params["w2"].astype(jnp.float32)
    w3 = params["w3"].astype(jnp.float32)
    h1 = s @ w1 + params["b1"]
    h1 = jnp.where(h1 >= 0.0, h1, 0.01 * h1)
    h2 = h1 @ w2 + params["b2"]
    h2 = jnp.where(h2 >= 0.0, h2, 0.01 * h2)
    a = jnp.tanh(h2 @ w3 + params["b3"])
    return a[:, :action_dim]


if __name__ == "__main__":
    key = jax.random.PRNGKey(0)
    k_params, k_small, k_big = jax.random.split(key, 3)

    batch, state_dim, action_dim = 2, 16, 4
    params = init_actor_params(k_params, state_dim, action_dim)

    # Small inference-style batch.
    s_small = jax.random.normal(k_small, (batch, state_dim), jnp.float32)
    a_small = jax.block_until_ready(actor_forward(s_small, params))
    r_small = _reference(s_small, params, action_dim)
    assert a_small.shape == (batch, action_dim)
    assert bool(jnp.all(jnp.abs(a_small) <= 1.0))
    assert bool(jnp.allclose(a_small, r_small, atol=3e-2, rtol=3e-2))

    # Larger training-style batch exercising the batch grid / resident weights.
    big_batch = 512
    s_big = jax.random.normal(k_big, (big_batch, state_dim), jnp.float32)
    a_big = jax.block_until_ready(actor_forward(s_big, params))
    r_big = _reference(s_big, params, action_dim)
    assert a_big.shape == (big_batch, action_dim)
    assert bool(jnp.all(jnp.abs(a_big) <= 1.0))
    assert bool(jnp.allclose(a_big, r_big, atol=3e-2, rtol=3e-2))

    print("KERNEL_OK")
</pallas_src>

<mosaic_0001>
module attributes {stable_mosaic.version = 11 : i64} {
  func.func @_actor_kernel(%arg0: i32, %arg1: memref<8x16xf32, #tpu.memory_space<vmem>>, %arg2: memref<16x512xbf16, #tpu.memory_space<vmem>>, %arg3: memref<1x512xf32, #tpu.memory_space<vmem>>, %arg4: memref<512x384xbf16, #tpu.memory_space<vmem>>, %arg5: memref<1x384xf32, #tpu.memory_space<vmem>>, %arg6: memref<384x128xbf16, #tpu.memory_space<vmem>>, %arg7: memref<1x128xf32, #tpu.memory_space<vmem>>, %arg8: memref<8x128xf32, #tpu.memory_space<vmem>>) attributes {dimension_semantics = [#tpu.dimension_semantics<parallel>], iteration_bounds = array<i64: 1>, scalar_prefetch = 0 : i64, scratch_operands = 0 : i64, tpu.core_type = #tpu.core_type<tc>, window_params = [{transform_indices = @transform_0, window_bounds = array<i64: 8, 16>}, {pipeline_mode = #tpu.pipeline_mode<synchronous>, transform_indices = @transform_1, window_bounds = array<i64: 16, 512>}, {pipeline_mode = #tpu.pipeline_mode<synchronous>, transform_indices = @transform_2, window_bounds = array<i64: 1, 512>}, {pipeline_mode = #tpu.pipeline_mode<synchronous>, transform_indices = @transform_3, window_bounds = array<i64: 512, 384>}, {pipeline_mode = #tpu.pipeline_mode<synchronous>, transform_indices = @transform_4, window_bounds = array<i64: 1, 384>}, {pipeline_mode = #tpu.pipeline_mode<synchronous>, transform_indices = @transform_5, window_bounds = array<i64: 384, 128>}, {pipeline_mode = #tpu.pipeline_mode<synchronous>, transform_indices = @transform_6, window_bounds = array<i64: 1, 128>}, {transform_indices = @transform_7, window_bounds = array<i64: 8, 128>}]} {
    %c0 = arith.constant 0 : index
    %c0_0 = arith.constant 0 : index
    %0 = vector.load %arg1[%c0, %c0_0] : memref<8x16xf32, #tpu.memory_space<vmem>>, vector<8x16xf32>
    %1 = arith.truncf %0 : vector<8x16xf32> to vector<8x16xbf16>
    %c0_1 = arith.constant 0 : index
    %c0_2 = arith.constant 0 : index
    %2 = vector.load %arg2[%c0_1, %c0_2] : memref<16x512xbf16, #tpu.memory_space<vmem>>, vector<16x512xbf16>
    %cst = arith.constant dense<0.000000e+00> : vector<8x512xf32>
    %3 = tpu.matmul %1, %2, %cst {dimension_numbers = #tpu.dot_dimension_numbers<[1], [0], [0], [1], [0, 0, 1, 1], [], []>} : vector<8x16xbf16>, vector<16x512xbf16>, vector<8x512xf32> -> vector<8x512xf32>
    %c0_3 = arith.constant 0 : index
    %c0_4 = arith.constant 0 : index
    %4 = vector.load %arg3[%c0_3, %c0_4] : memref<1x512xf32, #tpu.memory_space<vmem>>, vector<1x512xf32>
    %5 = vector.broadcast %4 : vector<1x512xf32> to vector<8x512xf32>
    %6 = arith.addf %3, %5 : vector<8x512xf32>
    %cst_5 = arith.constant 0.000000e+00 : f32
    %7 = vector.broadcast %cst_5 : f32 to vector<8x512xf32>
    %8 = arith.cmpf oge, %6, %7 : vector<8x512xf32>
    %cst_6 = arith.constant 0.00999999977 : f32
    %9 = vector.broadcast %cst_6 : f32 to vector<8x512xf32>
    %10 = arith.mulf %9, %6 : vector<8x512xf32>
    %11 = arith.select %8, %6, %10 : vector<8x512xi1>, vector<8x512xf32>
    %12 = arith.truncf %11 : vector<8x512xf32> to vector<8x512xbf16>
    %c0_7 = arith.constant 0 : index
    %c0_8 = arith.constant 0 : index
    %13 = vector.load %arg4[%c0_7, %c0_8] : memref<512x384xbf16, #tpu.memory_space<vmem>>, vector<512x384xbf16>
    %cst_9 = arith.constant dense<0.000000e+00> : vector<8x384xf32>
    %14 = tpu.matmul %12, %13, %cst_9 {dimension_numbers = #tpu.dot_dimension_numbers<[1], [0], [0], [1], [0, 0, 1, 1], [], []>} : vector<8x512xbf16>, vector<512x384xbf16>, vector<8x384xf32> -> vector<8x384xf32>
    %c0_10 = arith.constant 0 : index
    %c0_11 = arith.constant 0 : index
    %15 = vector.load %arg5[%c0_10, %c0_11] : memref<1x384xf32, #tpu.memory_space<vmem>>, vector<1x384xf32>
    %16 = vector.broadcast %15 : vector<1x384xf32> to vector<8x384xf32>
    %17 = arith.addf %14, %16 : vector<8x384xf32>
    %cst_12 = arith.constant 0.000000e+00 : f32
    %18 = vector.broadcast %cst_12 : f32 to vector<8x384xf32>
    %19 = arith.cmpf oge, %17, %18 : vector<8x384xf32>
    %cst_13 = arith.constant 0.00999999977 : f32
    %20 = vector.broadcast %cst_13 : f32 to vector<8x384xf32>
    %21 = arith.mulf %20, %17 : vector<8x384xf32>
    %22 = arith.select %19, %17, %21 : vector<8x384xi1>, vector<8x384xf32>
    %23 = arith.truncf %22 : vector<8x384xf32> to vector<8x384xbf16>
    %c0_14 = arith.constant 0 : index
    %c0_15 = arith.constant 0 : index
    %24 = vector.load %arg6[%c0_14, %c0_15] : memref<384x128xbf16, #tpu.memory_space<vmem>>, vector<384x128xbf16>
    %cst_16 = arith.constant dense<0.000000e+00> : vector<8x128xf32>
    %25 = tpu.matmul %23, %24, %cst_16 {dimension_numbers = #tpu.dot_dimension_numbers<[1], [0], [0], [1], [0, 0, 1, 1], [], []>} : vector<8x384xbf16>, vector<384x128xbf16>, vector<8x128xf32> -> vector<8x128xf32>
    %c0_17 = arith.constant 0 : index
    %c0_18 = arith.constant 0 : index
    %26 = vector.load %arg7[%c0_17, %c0_18] : memref<1x128xf32, #tpu.memory_space<vmem>>, vector<1x128xf32>
    %27 = vector.broadcast %26 : vector<1x128xf32> to vector<8x128xf32>
    %28 = arith.addf %25, %27 : vector<8x128xf32>
    %29 = math.tanh %28 : vector<8x128xf32>
    %c0_19 = arith.constant 0 : index
    %c0_20 = arith.constant 0 : index
    %30 = vector.load %arg8[%c0_19, %c0_20] : memref<8x128xf32, #tpu.memory_space<vmem>>, vector<8x128xf32>
    tpu.vector_store %arg8[%c0_19, %c0_20], %29 {strides = array<i32>} : memref<8x128xf32, #tpu.memory_space<vmem>>, vector<8x128xf32>,
    return
  }
  func.func @transform_0(%arg0: i32) -> (i32, i32) {
    %c0_i32 = arith.constant 0 : i32
    %c0_i32_0 = arith.constant 0 : i32
    return %arg0, %c0_i32 : i32, i32
  }
  func.func @transform_1(%arg0: i32) -> (i32, i32) {
    %c0_i32 = arith.constant 0 : i32
    %c0_i32_0 = arith.constant 0 : i32
    %c0_i32_1 = arith.constant 0 : i32
    return %c0_i32, %c0_i32_0 : i32, i32
  }
  func.func @transform_2(%arg0: i32) -> (i32, i32) {
    %c0_i32 = arith.constant 0 : i32
    %c0_i32_0 = arith.constant 0 : i32
    %c0_i32_1 = arith.constant 0 : i32
    return %c0_i32, %c0_i32_0 : i32, i32
  }
  func.func @transform_3(%arg0: i32) -> (i32, i32) {
    %c0_i32 = arith.constant 0 : i32
    %c0_i32_0 = arith.constant 0 : i32
    %c0_i32_1 = arith.constant 0 : i32
    return %c0_i32, %c0_i32_0 : i32, i32
  }
  func.func @transform_4(%arg0: i32) -> (i32, i32) {
    %c0_i32 = arith.constant 0 : i32
    %c0_i32_0 = arith.constant 0 : i32
    %c0_i32_1 = arith.constant 0 : i32
    return %c0_i32, %c0_i32_0 : i32, i32
  }
  func.func @transform_5(%arg0: i32) -> (i32, i32) {
    %c0_i32 = arith.constant 0 : i32
    %c0_i32_0 = arith.constant 0 : i32
    %c0_i32_1 = arith.constant 0 : i32
    return %c0_i32, %c0_i32_0 : i32, i32
  }
  func.func @transform_6(%arg0: i32) -> (i32, i32) {
    %c0_i32 = arith.constant 0 : i32
    %c0_i32_0 = arith.constant 0 : i32
    %c0_i32_1 = arith.constant 0 : i32
    return %c0_i32, %c0_i32_0 : i32, i32
  }
  func.func @transform_7(%arg0: i32) -> (i32, i32) {
    %c0_i32 = arith.constant 0 : i32
    %c0_i32_0 = arith.constant 0 : i32
    return %arg0, %c0_i32 : i32, i32
  }
}

</mosaic_0001>

<bundles_post_ra>
// kernel: tpu_custom_call.1
= control target key start
LH: loop header
LB: loop body
LE: loop exit
PB: predicated region body
PF: predicated region fallthrough
CT: control target
= control target key end

     0   :  { %12 = vsyncpa [#allocation3], 0  ;;  %s2030_s0 = inlined_call_operand.hbm [shape: f32[8,16], index: 0, kind: input, shape index: {}]   ;;  %s2031_s1 = inlined_call_operand.hbm [shape: bf16[16,512], index: 1, kind: input, shape index: {}]   ;;  %s2032_s2 = inlined_call_operand.vmem [shape: f32[1,512], index: 2, kind: input, shape index: {}]   ;;  %s2033_s3 = inlined_call_operand.hbm [shape: bf16[512,384], index: 3, kind: input, shape index: {}]   ;;  %s2034_s4 = inlined_call_operand.vmem [shape: f32[1,384], index: 4, kind: input, shape index: {}]   ;;  %s2035_s5 = inlined_call_operand.hbm [shape: bf16[384,128], index: 5, kind: input, shape index: {}]   ;;  %s2036_s6 = inlined_call_operand.vmem [shape: f32[1,128], index: 6, kind: input, shape index: {}]   ;;  %s2037_s7 = inlined_call_operand.hbm [shape: f32[8,128], index: 7, kind: output, shape index: {}]  }
   0x1   :  { %13 = vsyncpa [#allocation6], 0 }
   0x2   :  { %14 = vsyncpa [#allocation9], 0 }
   0x3   :  { %15 = vsyncpa [#allocation4], 0  ;;  %s1880_s24 = smov [#allocation5]   ;;  %s1762_s28 = scalar_lea.hbm %s2031_s1, 512 }
   0x4   :  { %s31_s25 = sshll.u32 %s1880_s24, 4  ;;  %p1763_p0 = scmp.ne.s32.totalorder %s2031_s1, %s1762_s28  ;;  %s32_s25 = int_to_ptr.vmem [resolvable:$true] %s31_s25 }
   0x5   :  { %p1766_p1 = scmp.lt.u32.totalorder %s1762_s28, %s2031_s1 }
   0x7   :  { %p1768_p2 = pnand %p1766_p1, %p1763_p0 }
   0x9   :  { %1771 = shalt.err (!%p1768_p2)
}
   0xa   :  { %s1772_s10 = scalar_lea.vmem %s32_s25, 512  ;;  %p1777_p4 = scmp.lt.s32.totalorder %s32_s25, %s32_s25 }
   0xb   :  { %p1773_p3 = scmp.ne.s32.totalorder %s32_s25, %s1772_s10  ;;  %p1778_p5 = scmp.lt.s32.totalorder %s1772_s10, %s1772_s10 }
   0xd   :  { %p1779_p6 = por %p1778_p5, %p1777_p4 }
   0xf   :  { %p1780_p7 = pnand %p1779_p6, %p1773_p3 }
  0x11   :  { %1783 = shalt.err (!%p1780_p7)
}
  0x12   :  { %s1881_s11 = smov 256   ;;  %s1882_s12 = smov 16  }
  0x13   :  { %37 = dma.hbm_to_vmem [thread:$0]  %s2031_s1, 512, %s32_s25, [#allocation6], %s1881_s11, %s1881_s11, %s1882_s12  }
  0x14   :  { %s1883_s15 = smov [#allocation2]   ;;  %s1884_s17 = smov [#allocation7]  }
  0x15   :  { %s22_s16 = sshll.u32 %s1883_s15, 4  ;;  %s45_s18 = sshll.u32 %s1884_s17, 4  ;;  %s23_s16 = int_to_ptr.vmem [resolvable:$true] %s22_s16  ;;  %s46_s18 = int_to_ptr.vmem [resolvable:$true] %s45_s18 }
  0x16   :  { %s1784_s21 = scalar_lea.hbm %s2030_s0, 128 }
  0x17   :  { %p1785_p8 = scmp.ne.s32.totalorder %s2030_s0, %s1784_s21  ;;  %p1788_p9 = scmp.lt.u32.totalorder %s1784_s21, %s2030_s0 }
  0x19   :  { %p1790_p10 = pnand %p1788_p9, %p1785_p8 }
  0x1b   :  { %1793 = shalt.err (!%p1790_p10)
}
  0x1c   :  { %s1794_s1 = scalar_lea.vmem %s23_s16, 128  ;;  %p1799_p12 = scmp.lt.s32.totalorder %s23_s16, %s23_s16 }
  0x1d   :  { %p1795_p11 = scmp.ne.s32.totalorder %s23_s16, %s1794_s1  ;;  %p1800_p13 = scmp.lt.s32.totalorder %s1794_s1, %s1794_s1 }
  0x1f   :  { %p1801_p0 = por %p1800_p13, %p1799_p12 }
  0x21   :  { %p1802_p1 = pnand %p1801_p0, %p1795_p11 }
  0x23   :  { %1805 = shalt.err (!%p1802_p1)
}
  0x24   :  { %25 = dma.hbm_to_vmem [thread:$0]  %s2030_s0, 128, %s23_s16, [#allocation3]  }
  0x25   :  { %s1806_s30 = scalar_lea.hbm %s2033_s3, 12288 }
  0x26   :  { %p1807_p2 = scmp.ne.s32.totalorder %s2033_s3, %s1806_s30  ;;  %p1810_p3 = scmp.lt.u32.totalorder %s1806_s30, %s2033_s3 }
  0x28   :  { %p1812_p4 = pnand %p1810_p3, %p1807_p2 }
  0x2a   :  { %1815 = shalt.err (!%p1812_p4)
}
  0x2b   :  { %s1816_s12 = scalar_lea.vmem %s46_s18, 12288  ;;  %p1821_p6 = scmp.lt.s32.totalorder %s46_s18, %s46_s18 }
  0x2c   :  { %p1817_p5 = scmp.ne.s32.totalorder %s46_s18, %s1816_s12  ;;  %p1822_p7 = scmp.lt.s32.totalorder %s1816_s12, %s1816_s12 }
  0x2e   :  { %p1823_p8 = por %p1822_p7, %p1821_p6 }
  0x30   :  { %p1824_p9 = pnand %p1823_p8, %p1817_p5 }
  0x32   :  { %1827 = shalt.err (!%p1824_p9)
}
  0x33   :  { %s1885_s0 = smov 192   ;;  %s1886_s13 = smov 12  }
  0x34   :  { %51 = dma.hbm_to_vmem [thread:$0]  %s2033_s3, 12288, %s46_s18, [#allocation6], %s1885_s0, %s1885_s0, %s1886_s13  }
  0x35   :  { %s1887_s16 = smov [#allocation8]   ;;  %s1828_s21 = scalar_lea.hbm %s2035_s5, 3072 }
  0x36   :  { %s59_s17 = sshll.u32 %s1887_s16, 4  ;;  %p1829_p10 = scmp.ne.s32.totalorder %s2035_s5, %s1828_s21  ;;  %s60_s17 = int_to_ptr.vmem [resolvable:$true] %s59_s17 }
  0x37   :  { %p1832_p11 = scmp.lt.u32.totalorder %s1828_s21, %s2035_s5 }
  0x39   :  { %p1834_p12 = pnand %p1832_p11, %p1829_p10 }
  0x3b   :  { %1837 = shalt.err (!%p1834_p12)
}
  0x3c   :  { %s1838_s1 = scalar_lea.vmem %s60_s17, 3072  ;;  %p1843_p0 = scmp.lt.s32.totalorder %s60_s17, %s60_s17 }
  0x3d   :  { %p1839_p13 = scmp.ne.s32.totalorder %s60_s17, %s1838_s1  ;;  %p1844_p1 = scmp.lt.s32.totalorder %s1838_s1, %s1838_s1 }
  0x3f   :  { %p1845_p2 = por %p1844_p1, %p1843_p0 }
  0x41   :  { %p1846_p3 = pnand %p1845_p2, %p1839_p13 }
  0x43   :  { %1849 = shalt.err (!%p1846_p3)
}
  0x44   :  { %s1888_s3 = smov 64   ;;  %s1889_s18 = smov 4  }
  0x45   :  { %65 = dma.hbm_to_vmem [thread:$0]  %s2035_s5, 3072, %s60_s17, [#allocation9], %s1888_s3, %s1888_s3, %s1889_s18  }
  0x46   :  { %1872 = dma.done.wait [#allocation3], 128  }
  0x47   :  { %1873 = vsyncadd [#allocation3], 4294967168 }
  0x48   :  { %1874 = dma.done.wait [#allocation6], 12800  }
  0x49   :  { %1875 = vsyncadd [#allocation6], 4294954496 }
  0x4a   :  { %1876 = dma.done.wait [#allocation9], 3072  }
  0x4b   :  { %1877 = vsyncadd [#allocation9], 4294964224  ;;  %v1890_v0 = vmov 0   ;;  %v1602_v1 = vld [vmem:[#allocation5 + $0x4] ss:$16 sps:$4 sm:$0xff]   ;;  %v81_v3 = vld [vmem:[#allocation2] sm:$0xff]  ;;  %v89_v57 = vlaneseq }
  0x4c   :  { %165 = vmatprep.mubr.bf16.mxu0 %v1890_v0  ;;  %206 = vmatprep.mubr.bf16.mxu1 %v1890_v0  ;;  %v1604_v2 = vld [vmem:[#allocation5] ss:$16 sps:$4 sm:$0xff]   ;;  %v82_v4 = vpack.c.bf16 %v81_v3, %v81_v3  ;;  %v1605_v5 = vld [vmem:[#allocation5 + $0xc] ss:$16 sps:$4 sm:$0xff]   ;;  %v1607_v6 = vld [vmem:[#allocation5 + $0x8] ss:$16 sps:$4 sm:$0xff]  }
  0x4d   :  { %133 = vmatprep.subr.bf16.mxu0 %v1602_v1  ;;  %vm129_vm0 = vcmask 130048   ;;  %v1608_v7 = vld [vmem:[#allocation7] ss:$12 sps:$4 sm:$0xff]   ;;  %174 = vmatprep.subr.bf16.mxu1 %v1605_v5  ;;  %v1610_v8 = vld [vmem:[#allocation7 + $0x4] ss:$12 sps:$4 sm:$0xff]   ;;  %v1982_v58 = vshrl.u32 %v89_v57, 7 }
  0x4e   :  { %134 = vmatpush1.bf16.msra.mxu0 %v1604_v2  ;;  %175 = vmatpush1.bf16.msra.mxu1 %v1607_v6  ;;  %v1613_v9 = vld [vmem:[#allocation7 + $0x1c] ss:$12 sps:$4 sm:$0xff]   ;;  %v1611_v10 = vld [vmem:[#allocation7 + $0x18] ss:$12 sps:$4 sm:$0xff]   ;;  %v1616_v11 = vld [vmem:[#allocation7 + $0x34] ss:$12 sps:$4 sm:$0xff]  }
  0x4f   :  { %888 = vmatprep.subr.bf16.mxu0 %v1610_v8  ;;  %v1614_v12 = vld [vmem:[#allocation7 + $0x30] ss:$12 sps:$4 sm:$0xff]   ;;  %v1619_v13 = vld [vmem:[#allocation7 + $0x4c] ss:$12 sps:$4 sm:$0xff]   ;;  %v1617_v14 = vld [vmem:[#allocation7 + $0x48] ss:$12 sps:$4 sm:$0xff]  }
  0x50   :  { %v1622_v15 = vld [vmem:[#allocation7 + $0x64] ss:$12 sps:$4 sm:$0xff]   ;;  %v1635_v16 = vld [vmem:[#allocation7 + $0xc8] ss:$12 sps:$4 sm:$0xff]   ;;  %v1620_v18 = vld [vmem:[#allocation7 + $0x60] ss:$12 sps:$4 sm:$0xff]  }
  0x51   :  { %1364 = vmatmul.mubr.msk.bf16.vlgmr.msra.gmra.mrb[0].mxu0 %vm129_vm0, %v82_v4  ;;  %1365 = vmatmul.mubr.msk.bf16.vlgmr.msra.gmra.mrb[0].mxu1 %vm129_vm0, %v82_v4  ;;  %v1636_v17 = vld [vmem:[#allocation7 + $0x8] ss:$12 sps:$4 sm:$0xff]   ;;  %v1640_v20 = vld [vmem:[#allocation7 + $0xe0] ss:$12 sps:$4 sm:$0xff]   ;;  %v1623_v22 = vld [vmem:[#allocation7 + $0x78] ss:$12 sps:$4 sm:$0xff]  }
  0x52   :  { %889 = vmatpush1.bf16.msra.mxu0 %v1608_v7  ;;  %1487 = vmatprep.subr.bf16.mxu1 %v1635_v16  ;;  %v1625_v19 = vld [vmem:[#allocation7 + $0x7c] ss:$12 sps:$4 sm:$0xff]   ;;  %v1641_v21 = vld [vmem:[#allocation7 + $0x20] ss:$12 sps:$4 sm:$0xff]   ;;  %v1645_v23 = vld [vmem:[#allocation7 + $0xf8] ss:$12 sps:$4 sm:$0xff]  }
  0x53   :  { %890 = vmatprep.subr.bf16.mxu0 %v1613_v9  ;;  %1488 = vmatpush3.bf16.msra.mxu1 %v1636_v17  ;;  %v1646_v24 = vld [vmem:[#allocation7 + $0x38] ss:$12 sps:$4 sm:$0xff]   ;;  %v1628_v25 = vld [vmem:[#allocation7 + $0x94] ss:$12 sps:$4 sm:$0xff]   ;;  %v1650_v26 = vld [vmem:[#allocation7 + $0x110] ss:$12 sps:$4 sm:$0xff]  }
  0x54   :  { %1489 = vmatprep.subr.bf16.mxu1 %v1640_v20  ;;  %v1651_v27 = vld [vmem:[#allocation7 + $0x50] ss:$12 sps:$4 sm:$0xff]   ;;  %v1631_v29 = vld [vmem:[#allocation7 + $0xac] ss:$12 sps:$4 sm:$0xff]   ;;  %v1655_v30 = vld [vmem:[#allocation7 + $0x128] ss:$12 sps:$4 sm:$0xff]  }
  0x55   :  { %v1626_v28 = vld [vmem:[#allocation7 + $0x90] ss:$12 sps:$4 sm:$0xff]   ;;  %v1656_v31 = vld [vmem:[#allocation7 + $0x68] ss:$12 sps:$4 sm:$0xff]   ;;  %v1660_v34 = vld [vmem:[#allocation7 + $0x140] ss:$12 sps:$4 sm:$0xff]  }
  0x56   :  { %891 = vmatpush1.bf16.msra.mxu0 %v1611_v10  ;;  %v1629_v32 = vld [vmem:[#allocation7 + $0xa8] ss:$12 sps:$4 sm:$0xff]   ;;  %v1634_v33 = vld [vmem:[#allocation7 + $0xc4] ss:$12 sps:$4 sm:$0xff]   ;;  %v1632_v35 = vld [vmem:[#allocation7 + $0xc0] ss:$12 sps:$4 sm:$0xff]  }
  0x57   :  { %892 = vmatprep.subr.bf16.mxu0 %v1616_v11  ;;  %1490 = vmatpush3.bf16.msra.mxu1 %v1641_v21  ;;  %v1661_v36 = vld [vmem:[#allocation7 + $0x80] ss:$12 sps:$4 sm:$0xff]   ;;  %v1639_v37 = vld [vmem:[#allocation7 + $0xdc] ss:$12 sps:$4 sm:$0xff]   ;;  %v1637_v38 = vld [vmem:[#allocation7 + $0xd8] ss:$12 sps:$4 sm:$0xff]  }
  0x58   :  { %1491 = vmatprep.subr.bf16.mxu1 %v1645_v23  ;;  %v1644_v39 = vld [vmem:[#allocation7 + $0xf4] ss:$12 sps:$4 sm:$0xff]   ;;  %v1642_v40 = vld [vmem:[#allocation7 + $0xf0] ss:$12 sps:$4 sm:$0xff]   ;;  %v1649_v41 = vld [vmem:[#allocation7 + $0x10c] ss:$12 sps:$4 sm:$0xff]  }
  0x59   :  { %v1647_v42 = vld [vmem:[#allocation7 + $0x108] ss:$12 sps:$4 sm:$0xff]   ;;  %v1654_v43 = vld [vmem:[#allocation7 + $0x124] ss:$12 sps:$4 sm:$0xff]   ;;  %v1652_v44 = vld [vmem:[#allocation7 + $0x120] ss:$12 sps:$4 sm:$0xff]  }
  0x5a   :  { %893 = vmatpush1.bf16.msra.mxu0 %v1614_v12  ;;  %v1659_v45 = vld [vmem:[#allocation7 + $0x13c] ss:$12 sps:$4 sm:$0xff]   ;;  %v1657_v46 = vld [vmem:[#allocation7 + $0x138] ss:$12 sps:$4 sm:$0xff]   ;;  %v1664_v47 = vld [vmem:[#allocation7 + $0x154] ss:$12 sps:$4 sm:$0xff]  }
  0x5b   :  { %894 = vmatprep.subr.bf16.mxu0 %v1619_v13  ;;  %1492 = vmatpush3.bf16.msra.mxu1 %v1646_v24  ;;  %v1665_v48 = vld [vmem:[#allocation7 + $0x158] ss:$12 sps:$4 sm:$0xff]   ;;  %v1662_v49 = vld [vmem:[#allocation7 + $0x150] ss:$12 sps:$4 sm:$0xff]   ;;  %v1667_v53 = vld [vmem:[#allocation7 + $0x168] ss:$12 sps:$4 sm:$0xff]  }
  0x5c   :  { %1493 = vmatprep.subr.bf16.mxu1 %v1650_v26  ;;  %v1666_v50 = vld [vmem:[#allocation7 + $0x98] ss:$12 sps:$4 sm:$0xff]   ;;  %v1670_v52 = vld [vmem:[#allocation7 + $0x170] ss:$12 sps:$4 sm:$0xff]   ;;  %v1675_v56 = vld [vmem:[#allocation7 + $0x248] ss:$12 sps:$4 sm:$0xff]  }
  0x5d   :  { %v1669_v51 = vld [vmem:[#allocation7 + $0x16c] ss:$12 sps:$4 sm:$0xff]   ;;  %v1671_v54 = vld [vmem:[#allocation7 + $0xb0] ss:$12 sps:$4 sm:$0xff]   ;;  %v91_v59 = vsub.s32 0, %v1982_v58  ;;  %v95_v61 = vsub.s32 1, %v1982_v58 }
  0x5e   :  { %895 = vmatpush1.bf16.msra.mxu0 %v1617_v14  ;;  %v1674_v55 = vld [vmem:[#allocation7 + $0x184] ss:$12 sps:$4 sm:$0xff]   ;;  %v1988_v60 = vld [vmem:[%s2032_s2] sm:$0xf]  ;;  %v103_v62 = vsub.s32 3, %v1982_v58  ;;  %vm1892_vm7 = vmmov 0  }
  0x5f   :  { %896 = vmatprep.subr.bf16.mxu0 %v1622_v15  ;;  %1494 = vmatpush3.bf16.msra.mxu1 %v1651_v27  ;;  %v92_v63 = vrot.slane %v1988_v60, %v91_v59  ;;  %v96_v0 = vrot.slane %v1988_v60, %v95_v61  ;;  %v1676_v20 = vld [vmem:[#allocation7 + $0x188] ss:$12 sps:$4 sm:$0xff]   ;;  %v1680_v23 = vld [vmem:[#allocation7 + $0x260] ss:$12 sps:$4 sm:$0xff]   ;;  %v1677_v26 = vld [vmem:[#allocation7 + $0x198] ss:$12 sps:$4 sm:$0xff]  }
  0x60   :  { %1495 = vmatprep.subr.bf16.mxu1 %v1655_v30  ;;  %v104_v2 = vrot.slane %v1988_v60, %v103_v62  ;;  %v1681_v27 = vld [vmem:[#allocation7 + $0x1a0] ss:$12 sps:$4 sm:$0xff]   ;;  %v1682_v30 = vld [vmem:[#allocation7 + $0x1b0] ss:$12 sps:$4 sm:$0xff]   ;;  %s1893_s8 = smov [#allocation10]  }
  0x61   :  { %v1714_v57 = vld [vmem:[#allocation7 + $0x244] ss:$12 sps:$4 sm:$0xff]   ;;  %v1712_v62 = vld [vmem:[#allocation7 + $0x240] ss:$12 sps:$4 sm:$0xff]   ;;  %s1349_s9 = sshll.u32 %s1893_s8, 4  ;;  %s1350_s9 = int_to_ptr.vmem [resolvable:$true] %s1349_s9 }
  0x62   :  { %897 = vmatpush1.bf16.msra.mxu0 %v1620_v18  ;;  %s1850_s10 = scalar_lea.vmem %s1350_s9, 128  ;;  %p1855_p5 = scmp.lt.s32.totalorder %s1350_s9, %s1350_s9 }
  0x63   :  { %898 = vmatprep.subr.bf16.mxu0 %v1625_v19  ;;  %1496 = vmatpush3.bf16.msra.mxu1 %v1656_v31  ;;  %v1672_v19 = vld [vmem:[#allocation7 + $0x180] ss:$12 sps:$4 sm:$0xff]   ;;  %v1686_v31 = vld [vmem:[#allocation7 + $0x1b8] ss:$12 sps:$4 sm:$0xff]   ;;  %p1851_p4 = scmp.ne.s32.totalorder %s1350_s9, %s1850_s10  ;;  %p1856_p6 = scmp.lt.s32.totalorder %s1850_s10, %s1850_s10 }
  0x64   :  { %1497 = vmatprep.subr.bf16.mxu1 %v1660_v34  ;;  %v1687_v34 = vld [vmem:[#allocation7 + $0x1c8] ss:$12 sps:$4 sm:$0xff]  }
  0x65   :  { %p1857_p7 = por %p1856_p6, %p1855_p5 }
  0x66   :  { %899 = vmatpush1.bf16.msra.mxu0 %v1623_v22  ;;  %v1679_v22 = vld [vmem:[#allocation7 + $0x19c] ss:$12 sps:$4 sm:$0xff]  }
  0x67   :  { %900 = vmatprep.subr.bf16.mxu0 %v1628_v25  ;;  %1498 = vmatpush3.bf16.msra.mxu1 %v1661_v36  ;;  %v99_v36 = vsub.s32 2, %v1982_v58  ;;  %v1753_v58 = vld [vmem:[#allocation8 + $0x88] sm:$0xff]   ;;  %p1858_p8 = pnand %p1857_p7, %p1851_p4 }
  0x68   :  { %1499 = vmatprep.subr.bf16.mxu1 %v1665_v48  ;;  %v1705_v48 = vld [vmem:[#allocation7 + $0x2d8] ss:$12 sps:$4 sm:$0xff]  }
  0x6a   :  { %901 = vmatpush1.bf16.msra.mxu0 %v1626_v28  ;;  %v1684_v28 = vld [vmem:[#allocation7 + $0x1b4] ss:$12 sps:$4 sm:$0xff]  }
  0x6b   :  { %902 = vmatprep.subr.bf16.mxu0 %v1631_v29  ;;  %1500 = vmatpush3.bf16.msra.mxu1 %v1666_v50  ;;  %v1685_v29 = vld [vmem:[#allocation7 + $0x278] ss:$12 sps:$4 sm:$0xff]   ;;  %v1702_v50 = vld [vmem:[#allocation7 + $0x210] ss:$12 sps:$4 sm:$0xff]  }
  0x6c   :  { %1501 = vmatprep.subr.bf16.mxu1 %v1670_v52  ;;  %v1709_v52 = vld [vmem:[#allocation7 + $0x22c] ss:$12 sps:$4 sm:$0xff]  }
  0x6e   :  { %903 = vmatpush1.bf16.msra.mxu0 %v1629_v32  ;;  %v1689_v32 = vld [vmem:[#allocation7 + $0x1cc] ss:$12 sps:$4 sm:$0xff]  }
  0x6f   :  { %904 = vmatprep.subr.bf16.mxu0 %v1634_v33  ;;  %1502 = vmatpush3.bf16.msra.mxu1 %v1671_v54  ;;  %v1690_v33 = vld [vmem:[#allocation7 + $0x290] ss:$12 sps:$4 sm:$0xff]  }
  0x70   :  { %1509 = vmatprep.subr.bf16.mxu1 %v1675_v56  ;;  %v1711_v56 = vld [vmem:[#allocation7 + $0x230] ss:$12 sps:$4 sm:$0xff]  }
  0x72   :  { %905 = vmatpush1.bf16.msra.mxu0 %v1632_v35  ;;  %v1691_v35 = vld [vmem:[#allocation7 + $0x1d0] ss:$12 sps:$4 sm:$0xff]  }
  0x73   :  { %906 = vmatprep.subr.bf16.mxu0 %v1639_v37  ;;  %v1694_v37 = vld [vmem:[#allocation7 + $0x1e4] ss:$12 sps:$4 sm:$0xff]  }
  0x76   :  { %907 = vmatpush1.bf16.msra.mxu0 %v1637_v38  ;;  %v1695_v38 = vld [vmem:[#allocation7 + $0x2a8] ss:$12 sps:$4 sm:$0xff]  }
  0x77   :  { %908 = vmatprep.subr.bf16.mxu0 %v1644_v39  ;;  %v1692_v39 = vld [vmem:[#allocation7 + $0x1e0] ss:$12 sps:$4 sm:$0xff]  }
  0x7a   :  { %909 = vmatpush1.bf16.msra.mxu0 %v1642_v40  ;;  %v1696_v40 = vld [vmem:[#allocation7 + $0x1e8] ss:$12 sps:$4 sm:$0xff]  }
  0x7b   :  { %910 = vmatprep.subr.bf16.mxu0 %v1649_v41  ;;  %v100_v41 = vrot.slane %v1988_v60, %v99_v36 }
  0x7e   :  { %911 = vmatpush1.bf16.msra.mxu0 %v1647_v42  ;;  %v1699_v42 = vld [vmem:[#allocation7 + $0x1fc] ss:$12 sps:$4 sm:$0xff]  }
  0x7f   :  { %912 = vmatprep.subr.bf16.mxu0 %v1654_v43  ;;  %v1700_v43 = vld [vmem:[#allocation7 + $0x2c0] ss:$12 sps:$4 sm:$0xff]  }
  0x82   :  { %913 = vmatpush1.bf16.msra.mxu0 %v1652_v44  ;;  %v1697_v44 = vld [vmem:[#allocation7 + $0x1f8] ss:$12 sps:$4 sm:$0xff]  }
  0x83   :  { %914 = vmatprep.subr.bf16.mxu0 %v1659_v45  ;;  %v1701_v45 = vld [vmem:[#allocation7 + $0x200] ss:$12 sps:$4 sm:$0xff]  }
  0x86   :  { %915 = vmatpush1.bf16.msra.mxu0 %v1657_v46 }
  0x87   :  { %916 = vmatprep.subr.bf16.mxu0 %v1664_v47  ;;  %v1704_v47 = vld [vmem:[#allocation7 + $0x214] ss:$12 sps:$4 sm:$0xff]  }
  0x8a   :  { %917 = vmatpush1.bf16.msra.mxu0 %v1662_v49 }
  0x8b   :  { %918 = vmatprep.subr.bf16.mxu0 %v1669_v51  ;;  %v1706_v51 = vld [vmem:[#allocation7 + $0x218] ss:$12 sps:$4 sm:$0xff]  }
  0x8e   :  { %919 = vmatpush1.bf16.msra.mxu0 %v1667_v53  ;;  %v1710_v53 = vld [vmem:[#allocation7 + $0x2f0] ss:$12 sps:$4 sm:$0xff]  }
  0x8f   :  { %929 = vmatprep.subr.bf16.mxu0 %v1674_v55  ;;  %v1707_v55 = vld [vmem:[#allocation7 + $0x228] ss:$12 sps:$4 sm:$0xff]  }
 0x124   :  { %v167_v1 = vpop.f32.mrb[0].mxu0  ;;  %v1999_v7 = vpop.f32.mrb[0].mxu1 }
 0x125   :  { %v168_v3 = vadd.f32 %v167_v1, %v92_v63  ;;  %v169_v4 = vpop.f32.mrb[1].mxu0  ;;  %v210_v10 = vpop.f32.mrb[1].mxu1  ;;  %v209_v46 = vadd.f32 %v1999_v7, %v100_v41  ;;  %v1717_v63 = vld [vmem:[#allocation7 + $0x25c] ss:$12 sps:$4 sm:$0xff]   ;;  %v1720_v1 = vld [vmem:[#allocation7 + $0x274] ss:$12 sps:$4 sm:$0xff]  }
 0x126   :  { %v170_v5 = vadd.f32 %v169_v4, %v96_v0  ;;  %v171_v6 = vpop.f32.mrb[2].mxu0  ;;  %v211_v12 = vadd.f32 %v210_v10, %v104_v2  ;;  %v212_v13 = vpop.f32.mrb[2].mxu1  ;;  %v1715_v0 = vld [vmem:[#allocation7 + $0x258] ss:$12 sps:$4 sm:$0xff]   ;;  %v1718_v2 = vld [vmem:[#allocation7 + $0x270] ss:$12 sps:$4 sm:$0xff]  }
 0x127   :  { %vm215_vm1 = vcmp.ge.f32.partialorder %v168_v3, 0.0  ;;  %v219_v8 = vmul.f32 0.01, %v168_v3  ;;  %v172_v9 = vpop.f32.mrb[3].mxu0  ;;  %v213_v15 = vpop.f32.mrb[3].mxu1  ;;  %vm217_vm4 = vcmp.ge.f32.partialorder %v209_v46, 0.0 }
 0x128   :  { %vm216_vm2 = vcmp.ge.f32.partialorder %v170_v5, 0.0  ;;  %v220_v11 = vmul.f32 0.01, %v170_v5  ;;  %vm218_vm3 = vcmp.ge.f32.partialorder %v211_v12, 0.0  ;;  %v222_v17 = vmul.f32 0.01, %v211_v12 }
 0x129   :  { %v223_v14 = vsel %vm215_vm1, %v168_v3, %v219_v8  ;;  %v221_v49 = vmul.f32 0.01, %v209_v46  ;;  %v1723_v3 = vld [vmem:[#allocation7 + $0x28c] ss:$12 sps:$4 sm:$0xff]   ;;  %v1721_v4 = vld [vmem:[#allocation7 + $0x288] ss:$12 sps:$4 sm:$0xff]  }
 0x12a   :  { %v224_v16 = vsel %vm216_vm2, %v170_v5, %v220_v11  ;;  %v227_v21 = vpack.c.bf16 %v223_v14, %v223_v14  ;;  %v226_v24 = vsel %vm218_vm3, %v211_v12, %v222_v17  ;;  %v1726_v5 = vld [vmem:[#allocation7 + $0x2a4] ss:$12 sps:$4 sm:$0xff]   ;;  %v1724_v6 = vld [vmem:[#allocation7 + $0x2a0] ss:$12 sps:$4 sm:$0xff]   ;;  %v1729_v7 = vld [vmem:[#allocation7 + $0x2bc] ss:$12 sps:$4 sm:$0xff]  }
 0x12b   :  { %v228_v18 = vpack.c.bf16 %v224_v16, %v224_v16  ;;  %v230_v25 = vpack.c.bf16 %v226_v24, %v226_v24  ;;  %v225_v54 = vsel %vm217_vm4, %v209_v46, %v221_v49  ;;  %v1727_v8 = vld [vmem:[#allocation7 + $0x2b8] ss:$12 sps:$4 sm:$0xff]   ;;  %v1732_v9 = vld [vmem:[#allocation7 + $0x2d4] ss:$12 sps:$4 sm:$0xff]   ;;  %v1730_v10 = vld [vmem:[#allocation7 + $0x2d0] ss:$12 sps:$4 sm:$0xff]  }
 0x12c   :  { %v229_v60 = vpack.c.bf16 %v225_v54, %v225_v54  ;;  %v1735_v11 = vld [vmem:[#allocation7 + $0x2ec] ss:$12 sps:$4 sm:$0xff]   ;;  %v1733_v12 = vld [vmem:[#allocation7 + $0x2e8] ss:$12 sps:$4 sm:$0xff]   ;;  %v1736_v13 = vld [vmem:[#allocation8 + $0x40] sm:$0xff]  }
 0x12d   :  { %920 = vmatprep.mubr.bf16.mxu0 %v228_v18  ;;  %1002 = vmatprep.mubr.bf16.mxu1 %v228_v18  ;;  %v1737_v14 = vld [vmem:[#allocation8] sm:$0xff]   ;;  %v1738_v15 = vld [vmem:[#allocation8 + $0x48] sm:$0xff]   ;;  %v1740_v17 = vld [vmem:[#allocation8 + $0x50] sm:$0xff]  }
 0x12e   :  { %921 = vmatmul.mubr.bf16.vlgmr.msra.gmra.mrb[4].mxu0 %v227_v21  ;;  %1003 = vmatmul.mubr.bf16.vlgmr.msra.gmra.mrb[4].mxu1 %v227_v21  ;;  %v1739_v16 = vld [vmem:[#allocation8 + $0x8] sm:$0xff]   ;;  %v1741_v18 = vld [vmem:[#allocation8 + $0x10] sm:$0xff]   ;;  %v1744_v21 = vld [vmem:[#allocation8 + $0x60] sm:$0xff]  }
 0x12f   :  { %930 = vmatpush1.bf16.msra.mxu0 %v1672_v19  ;;  %1510 = vmatpush3.bf16.msra.mxu1 %v1676_v20  ;;  %v1742_v19 = vld [vmem:[#allocation8 + $0x58] sm:$0xff]   ;;  %v1747_v24 = vld [vmem:[#allocation8 + $0x28] sm:$0xff]  }
 0x130   :  { %931 = vmatprep.subr.bf16.mxu0 %v1679_v22  ;;  %1511 = vmatprep.subr.bf16.mxu1 %v1680_v23  ;;  %v1743_v20 = vld [vmem:[#allocation8 + $0x18] sm:$0xff]   ;;  %v1745_v22 = vld [vmem:[#allocation8 + $0x20] sm:$0xff]   ;;  %v1746_v23 = vld [vmem:[#allocation8 + $0x68] sm:$0xff]  }
 0x131   :  { %1042 = vmatprep.mubr.bf16.mxu1 %v230_v25  ;;  %961 = vmatprep.mubr.bf16.mxu0 %v230_v25  ;;  %v1748_v25 = vld [vmem:[#allocation8 + $0x70] sm:$0xff]  }
 0x133   :  { %932 = vmatpush1.bf16.msra.mxu0 %v1677_v26  ;;  %1512 = vmatpush3.bf16.msra.mxu1 %v1681_v27  ;;  %v1749_v26 = vld [vmem:[#allocation8 + $0x30] sm:$0xff]   ;;  %v1750_v27 = vld [vmem:[#allocation8 + $0x78] sm:$0xff]  }
 0x134   :  { %933 = vmatprep.subr.bf16.mxu0 %v1684_v28  ;;  %1513 = vmatprep.subr.bf16.mxu1 %v1685_v29  ;;  %v1751_v28 = vld [vmem:[#allocation8 + $0x38] sm:$0xff]   ;;  %v1891_v29 = vmov 0.0  }
 0x137   :  { %934 = vmatpush1.bf16.msra.mxu0 %v1682_v30  ;;  %1514 = vmatpush3.bf16.msra.mxu1 %v1686_v31 }
 0x138   :  { %935 = vmatprep.subr.bf16.mxu0 %v1689_v32  ;;  %1515 = vmatprep.subr.bf16.mxu1 %v1690_v33 }
 0x13b   :  { %936 = vmatpush1.bf16.msra.mxu0 %v1687_v34  ;;  %1516 = vmatpush3.bf16.msra.mxu1 %v1691_v35  ;;  %v359_v35 = vld [vmem:[%s2034_s4] sm:$0x7] }
 0x13c   :  { %937 = vmatprep.subr.bf16.mxu0 %v1694_v37  ;;  %1517 = vmatprep.subr.bf16.mxu1 %v1695_v38  ;;  %v372_v37 = vrot.slane %v359_v35, %v99_v36  ;;  %v368_v46 = vrot.slane %v359_v35, %v95_v61  ;;  %v1755_v61 = vld [vmem:[#allocation8 + $0x98] sm:$0xff]  }
 0x13f   :  { %938 = vmatpush1.bf16.msra.mxu0 %v1692_v39  ;;  %1518 = vmatpush3.bf16.msra.mxu1 %v1696_v40 }
 0x140   :  { %939 = vmatprep.subr.bf16.mxu0 %v1699_v42  ;;  %1519 = vmatprep.subr.bf16.mxu1 %v1700_v43 }
 0x143   :  { %940 = vmatpush1.bf16.msra.mxu0 %v1697_v44  ;;  %1520 = vmatpush3.bf16.msra.mxu1 %v1701_v45  ;;  %v364_v45 = vrot.slane %v359_v35, %v91_v59  ;;  %v1754_v59 = vld [vmem:[#allocation8 + $0x90] sm:$0xff]  }
 0x144   :  { %941 = vmatprep.subr.bf16.mxu0 %v1704_v47  ;;  %1521 = vmatprep.subr.bf16.mxu1 %v1705_v48 }
 0x147   :  { %942 = vmatpush1.bf16.msra.mxu0 %v1702_v50  ;;  %1522 = vmatpush3.bf16.msra.mxu1 %v1706_v51 }
 0x148   :  { %943 = vmatprep.subr.bf16.mxu0 %v1709_v52  ;;  %1523 = vmatprep.subr.bf16.mxu1 %v1710_v53 }
 0x14b   :  { %944 = vmatpush1.bf16.msra.mxu0 %v1707_v55  ;;  %1524 = vmatpush3.bf16.msra.mxu1 %v1711_v56 }
 0x14c   :  { %945 = vmatprep.subr.bf16.mxu0 %v1714_v57  ;;  %1531 = vmatprep.subr.bf16.mxu1 %v1736_v13  ;;  %v1752_v57 = vld [vmem:[#allocation8 + $0x80] sm:$0xff]  }
 0x14e   :  { %1043 = vmatmul.mubr.bf16.vlgmr.msra.gmra.mrb[8].mxu1 %v229_v60 }
 0x14f   :  { %946 = vmatpush1.bf16.msra.mxu0 %v1712_v62  ;;  %1532 = vmatpush3.bf16.msra.mxu1 %v1737_v14  ;;  %v1756_v62 = vld [vmem:[#allocation8 + $0xa0] sm:$0xff]  }
 0x150   :  { %947 = vmatprep.subr.bf16.mxu0 %v1717_v63  ;;  %1533 = vmatprep.subr.bf16.mxu1 %v1738_v15  ;;  %v1757_v63 = vld [vmem:[#allocation8 + $0xa8] sm:$0xff]  }
 0x153   :  { %948 = vmatpush1.bf16.msra.mxu0 %v1715_v0  ;;  %1534 = vmatpush3.bf16.msra.mxu1 %v1739_v16  ;;  %v1758_v0 = vld [vmem:[#allocation8 + $0xb0] sm:$0xff]  }
 0x154   :  { %949 = vmatprep.subr.bf16.mxu0 %v1720_v1  ;;  %1535 = vmatprep.subr.bf16.mxu1 %v1740_v17 }
 0x157   :  { %950 = vmatpush1.bf16.msra.mxu0 %v1718_v2  ;;  %1536 = vmatpush3.bf16.msra.mxu1 %v1741_v18  ;;  %v1759_v2 = vld [vmem:[#allocation8 + $0xb8] sm:$0xff]  }
 0x158   :  { %951 = vmatprep.subr.bf16.mxu0 %v1723_v3  ;;  %1537 = vmatprep.subr.bf16.mxu1 %v1742_v19 }
 0x15b   :  { %952 = vmatpush1.bf16.msra.mxu0 %v1721_v4  ;;  %1538 = vmatpush3.bf16.msra.mxu1 %v1743_v20 }
 0x15c   :  { %953 = vmatprep.subr.bf16.mxu0 %v1726_v5  ;;  %1539 = vmatprep.subr.bf16.mxu1 %v1744_v21 }
 0x15f   :  { %954 = vmatpush1.bf16.msra.mxu0 %v1724_v6  ;;  %1540 = vmatpush3.bf16.msra.mxu1 %v1745_v22 }
 0x160   :  { %955 = vmatprep.subr.bf16.mxu0 %v1729_v7  ;;  %1541 = vmatprep.subr.bf16.mxu1 %v1746_v23 }
 0x163   :  { %956 = vmatpush1.bf16.msra.mxu0 %v1727_v8  ;;  %1542 = vmatpush3.bf16.msra.mxu1 %v1747_v24 }
 0x164   :  { %957 = vmatprep.subr.bf16.mxu0 %v1732_v9  ;;  %1543 = vmatprep.subr.bf16.mxu1 %v1748_v25 }
 0x167   :  { %958 = vmatpush1.bf16.msra.mxu0 %v1730_v10  ;;  %1544 = vmatpush3.bf16.msra.mxu1 %v1749_v26  ;;  %v1462_v10 = vld [vmem:[%s2036_s6] ss:$0 sm:$0xff] }
 0x168   :  { %959 = vmatprep.subr.bf16.mxu0 %v1735_v11  ;;  %1545 = vmatprep.subr.bf16.mxu1 %v1750_v27 }
 0x16b   :  { %960 = vmatpush1.bf16.msra.mxu0 %v1733_v12  ;;  %1546 = vmatpush3.bf16.msra.mxu1 %v1751_v28 }
 0x16c   :  { %1562 = vmatprep.subr.bf16.mxu1 %v1891_v29 }
 0x16e   :  { %962 = vmatmul.mubr.bf16.vlgmr.msra.gmra.mrb[4].mxu0 %v229_v60 }
 0x201   :  { %v1503_v30 = vpop.f32.mrb[4].mxu1 }
 0x202   :  { %v1504_v31 = vpop.f32.mrb[5].mxu1 }
 0x203   :  { %v1505_v32 = vadd.f32 %v1504_v31, %v1503_v30  ;;  %v1506_v33 = vpop.f32.mrb[6].mxu1 }
 0x204   :  { %v1507_v34 = vpop.f32.mrb[7].mxu1 }
 0x205   :  { %v1005_v40 = vadd.f32 %v1505_v32, %v372_v37 }
 0x221   :  { %v1525_v38 = vpop.f32.mrb[8].mxu1 }
 0x222   :  { %v1526_v39 = vpop.f32.mrb[9].mxu1 }
 0x223   :  { %v1527_v41 = vadd.f32 %v1526_v39, %v1525_v38  ;;  %v1528_v42 = vpop.f32.mrb[10].mxu1 }
 0x224   :  { %v1529_v43 = vpop.f32.mrb[11].mxu1 }
 0x225   :  { %v1045_v44 = vadd.f32 %v1527_v41, %v1005_v40 }
 0x227   :  { %v1055_v1 = vmul.f32 0.01, %v1045_v44  ;;  %vm1052_vm8 = vcmp.ge.f32.partialorder %v1045_v44, 0.0 }
 0x229   :  { %v1058_v3 = vsel %vm1052_vm8, %v1045_v44, %v1055_v1 }
 0x22a   :  { %v1061_v4 = vpack.c.bf16 %v1058_v3, %v1058_v3 }
 0x241   :  { %v963_v47 = vpop.f32.mrb[4].mxu0 }
 0x242   :  { %v1582_v48 = vadd.f32 %v963_v47, %v364_v45  ;;  %v965_v49 = vpop.f32.mrb[5].mxu0 }
 0x243   :  { %v1583_v50 = vadd.f32 %v965_v49, %v368_v46  ;;  %v967_v51 = vpop.f32.mrb[6].mxu0 }
 0x244   :  { %vm1050_vm5 = vcmp.ge.f32.partialorder %v1582_v48, 0.0  ;;  %v1053_v36 = vmul.f32 0.01, %v1582_v48  ;;  %v968_v52 = vpop.f32.mrb[7].mxu0 }
 0x245   :  { %vm1051_vm6 = vcmp.ge.f32.partialorder %v1583_v50, 0.0  ;;  %v1054_v53 = vmul.f32 0.01, %v1583_v50 }
 0x246   :  { %v1056_v54 = vsel %vm1050_vm5, %v1582_v48, %v1053_v36 }
 0x247   :  { %v1057_v55 = vsel %vm1051_vm6, %v1583_v50, %v1054_v53  ;;  %v1059_v60 = vpack.c.bf16 %v1056_v54, %v1056_v54 }
 0x248   :  { %v1060_v56 = vpack.c.bf16 %v1057_v55, %v1057_v55 }
 0x24a   :  { %1293 = vmatprep.mubr.bf16.mxu1 %v1060_v56 }
 0x24b   :  { %1294 = vmatmul.mubr.bf16.vlgmr.msra.gmra.mrb[12].mxu1 %v1059_v60 }
 0x24c   :  { %1563 = vmatpush3.bf16.msra.mxu1 %v1752_v57  ;;  %1578 = vmatprep.mubr.msk.bf16.mxu1 %vm1892_vm7, %v1891_v29 }
 0x24d   :  { %1564 = vmatprep.subr.bf16.mxu1 %v1891_v29 }
 0x250   :  { %1565 = vmatpush3.bf16.msra.mxu1 %v1753_v58 }
 0x251   :  { %1566 = vmatprep.subr.bf16.mxu1 %v1891_v29 }
 0x254   :  { %1567 = vmatpush3.bf16.msra.mxu1 %v1754_v59 }
 0x255   :  { %1568 = vmatprep.subr.bf16.mxu1 %v1891_v29 }
 0x258   :  { %1569 = vmatpush3.bf16.msra.mxu1 %v1755_v61 }
 0x259   :  { %1570 = vmatprep.subr.bf16.mxu1 %v1891_v29 }
 0x25c   :  { %1571 = vmatpush3.bf16.msra.mxu1 %v1756_v62 }
 0x25d   :  { %1572 = vmatprep.subr.bf16.mxu1 %v1891_v29 }
 0x260   :  { %1573 = vmatpush3.bf16.msra.mxu1 %v1757_v63 }
 0x261   :  { %1574 = vmatprep.subr.bf16.mxu1 %v1891_v29 }
 0x264   :  { %1575 = vmatpush3.bf16.msra.mxu1 %v1758_v0 }
 0x265   :  { %1576 = vmatprep.subr.bf16.mxu1 %v1891_v29 }
 0x268   :  { %1577 = vmatpush3.bf16.msra.mxu1 %v1759_v2 }
 0x26b   :  { %1579 = vmatmul.mubr.bf16.vlgmr.msra.gmra.mrb[16].mxu1 %v1061_v4 }
 0x31e   :  { %v1547_v5 = vpop.f32.mrb[12].mxu1 }
 0x31f   :  { %v1548_v6 = vpop.f32.mrb[13].mxu1 }
 0x320   :  { %v1549_v7 = vadd.f32 %v1548_v6, %v1547_v5  ;;  %v1550_v8 = vpop.f32.mrb[14].mxu1 }
 0x321   :  { %v1551_v9 = vpop.f32.mrb[15].mxu1 }
 0x322   :  { %v1296_v11 = vadd.f32 %v1549_v7, %v1462_v10 }
 0x33e   :  { %v1335_v12 = vpop.f32.mrb[16].mxu1 }
 0x33f   :  { %v1336_v13 = vadd.f32 %v1335_v12, %v1296_v11  ;;  %v1580_v14 = vpop.f32.mrb[17].mxu1 }
 0x340   :  { %v1338_v15 = vpop.f32.mrb[18].mxu1 }
 0x341   :  { %1760 = vtanh.f32 %v1336_v13  ;;  %v1581_v16 = vpop.f32.mrb[19].mxu1 }
 0x34b   :  { %v1761_v17 = vpop.eup %1760 }
 0x34c   :  { %1342 = vst [vmem:[#allocation10] sm:$0xff] %v1761_v17 }
 0x34d   :  { %1861 = shalt.err (!%p1858_p8)
}
 0x34e   :  { %s1862_s12 = scalar_lea.hbm %s2037_s7, 128 }
 0x34f   :  { %p1863_p9 = scmp.ne.s32.totalorder %s2037_s7, %s1862_s12  ;;  %p1866_p10 = scmp.lt.u32.totalorder %s1862_s12, %s2037_s7 }
 0x351   :  { %p1868_p11 = pnand %p1866_p10, %p1863_p9 }
 0x353   :  { %1871 = shalt.err (!%p1868_p11)
}
 0x354   :  { %1352 = dma.vmem_to_hbm [thread:$0]  %s1350_s9, 128, %s2037_s7, [#allocation4]  }
 0x355   :  { %1878 = dma.done.wait [#allocation4], 128  }
 0x356   :  { %1879 = vsyncadd [#allocation4], 4294967168 }
 0x357   :  { %1356 = vsyncpa [#allocation3], 1 }
 0x358   :  { %1357 = vsyncpa [#allocation6], 1 }
 0x359   :  { %1358 = vsyncpa [#allocation9], 1 }
 0x35a   :  { %1359 = vsyncpa [#allocation4], 1 }

</bundles_post_ra>
